<compile_context>
chip_gen: v7x
topology: tpu7x:2x2x1
jax: 0.10.0
libtpu: 0.0.40
codegen_flags: <defaults>
</compile_context>

<pallas_src>
import jax
import jax.numpy as jnp
from jax.experimental import pallas as pl
from jax.experimental.pallas import tpu as pltpu

HIDDEN = 512
OUT_DIM = 4
NUM_LAYERS = 8
SKIP_AT = 4          # residual add happens right before layer index 4
MAX_ROW_BLOCK = 256  # rows of the batch processed per "parallel" grid step


def _round_up(n, m):
    return ((n + m - 1) // m) * m


def _make_fnet_kernel(tq, broadcast_x):
    """Builds the kernel body for a fixed row-block size / broadcast mode."""

    def kernel(x0_ref, skip_ref, w_ref, b_ref, wo_ref, bo_ref, y_ref, h_ref):
        # Grid: (row_block q [parallel], layer l [arbitrary]).
        layer = pl.program_id(1)

        @pl.when(layer == 0)
        def _init():
            if broadcast_x:
                # x is a single row: broadcast it across the row block in VMEM
                # (no XLA-side broadcast_to materialization, no duplicate DMA).
                h_ref[...] = jnp.broadcast_to(
                    x0_ref[...].astype(jnp.float32), (tq, HIDDEN))
            else:
                # x already spans the full batch: it is identical to `skip`.
                h_ref[...] = skip_ref[...].astype(jnp.float32)

        @pl.when(layer == SKIP_AT)
        def _skip_add():
            h_ref[...] = h_ref[...] + skip_ref[...].astype(jnp.float32)

        # Hidden layer `layer`: bf16 MXU matmul with f32 accumulation + SiLU.
        z = jnp.dot(h_ref[...].astype(jnp.bfloat16), w_ref[0],
                    preferred_element_type=jnp.float32) + b_ref[0]
        h_ref[...] = z * jax.nn.sigmoid(z)

        @pl.when(layer == NUM_LAYERS - 1)
        def _head():
            y = jnp.dot(h_ref[...].astype(jnp.bfloat16), wo_ref[...],
                        preferred_element_type=jnp.float32) + bo_ref[...]
            y_ref[...] = y.astype(y_ref.dtype)

    return kernel


def init_params(key):
    """Deterministic synthetic parameters (PyTorch-style uniform(+-1/sqrt(fan_in))).

    Weights are stored in bfloat16 (the kernel is weight-bandwidth bound);
    biases stay float32; all matmuls accumulate in float32 on the MXU.
    """
    keys = jax.random.split(key, 2 * NUM_LAYERS + 2)
    s = 1.0 / jnp.sqrt(jnp.float32(HIDDEN))
    w = jnp.stack([
        jax.random.uniform(keys[i], (HIDDEN, HIDDEN), jnp.float32, -s, s)
        for i in range(NUM_LAYERS)
    ]).astype(jnp.bfloat16)                                        # (8,512,512) (in,out)
    b = jnp.stack([
        jax.random.uniform(keys[NUM_LAYERS + i], (1, HIDDEN), jnp.float32, -s, s)
        for i in range(NUM_LAYERS)
    ])                                                             # (8,1,512) f32
    wo = jax.random.uniform(
        keys[-2], (HIDDEN, OUT_DIM), jnp.float32, -s, s).astype(jnp.bfloat16)
    bo = jax.random.uniform(keys[-1], (1, OUT_DIM), jnp.float32, -s, s)
    return w, b, wo, bo


def f_net_forward(x, x_feature, params):
    """Batch concat / padding in XLA, then one pipelined pallas_call."""
    w, b, wo, bo = params
    skip = jnp.concatenate([x, x_feature], axis=0).astype(jnp.float32)  # (B, 512)
    B = skip.shape[0]
    N = x.shape[0]
    assert N == 1 or N == B, "skip-add only defined when x broadcasts against skip"
    broadcast_x = (N == 1)

    tq = min(MAX_ROW_BLOCK, _round_up(B, 8))   # row-block size (sublane-aligned)
    b_pad = _round_up(B, tq)
    num_q = b_pad // tq
    if b_pad != B:
        skip = jnp.pad(skip, ((0, b_pad - B), (0, 0)))
    x0 = x[0:1].astype(jnp.float32)            # single query row (read iff broadcasting)

    kernel = _make_fnet_kernel(tq, broadcast_x)
    grid_spec = pltpu.PrefetchScalarGridSpec(
        num_scalar_prefetch=0,
        grid=(num_q, NUM_LAYERS),
        in_specs=[
            pl.BlockSpec((1, HIDDEN), lambda q, l: (0, 0)),             # x0 (resident)
            pl.BlockSpec((tq, HIDDEN), lambda q, l: (q, 0)),            # skip row block
            pl.BlockSpec((1, HIDDEN, HIDDEN), lambda q, l: (l, 0, 0)),  # per-layer W (streamed)
            pl.BlockSpec((1, 1, HIDDEN), lambda q, l: (l, 0, 0)),       # per-layer bias
            pl.BlockSpec((HIDDEN, OUT_DIM), lambda q, l: (0, 0)),       # head W (resident)
            pl.BlockSpec((1, OUT_DIM), lambda q, l: (0, 0)),            # head bias
        ],
        out_specs=pl.BlockSpec((tq, OUT_DIM), lambda q, l: (q, 0)),
        scratch_shapes=[pltpu.VMEM((tq, HIDDEN), jnp.float32)],         # activation carry
    )
    y = pl.pallas_call(
        kernel,
        out_shape=jax.ShapeDtypeStruct((b_pad, OUT_DIM), jnp.float32),
        grid_spec=grid_spec,
        compiler_params=pltpu.CompilerParams(
            dimension_semantics=("parallel", "arbitrary")),
    )(x0, skip, w, b, wo, bo)

    # Head postprocessing (tiny) stays in XLA: return row 0 and relu(rows 1:3).
    return y[0], jnp.maximum(y[1:3], 0.0)


def f_net_reference(x, x_feature, params):
    """Pure-JAX reference with identical (bf16-weight, f32-accum) numerics."""
    w, b, wo, bo = params
    skip = jnp.concatenate([x, x_feature], axis=0).astype(jnp.float32)
    B = skip.shape[0]
    if x.shape[0] == 1:
        h = jnp.broadcast_to(x.astype(jnp.float32), (B, HIDDEN))
    else:
        h = x.astype(jnp.float32)
    for i in range(NUM_LAYERS):
        if i == SKIP_AT:
            h = h + skip
        z = jnp.dot(h.astype(jnp.bfloat16), w[i],
                    preferred_element_type=jnp.float32) + b[i]
        h = z * jax.nn.sigmoid(z)
    y = jnp.dot(h.astype(jnp.bfloat16), wo,
                preferred_element_type=jnp.float32) + bo
    return y[0], jnp.maximum(y[1:3], 0.0)


if __name__ == "__main__":
    key = jax.random.PRNGKey(0)
    kp, kx, kf = jax.random.split(key, 3)
    params = init_params(kp)

    x = jax.random.normal(kx, (1, HIDDEN), jnp.float32)          # single query row
    x_feature = jax.random.normal(kf, (3, HIDDEN), jnp.float32)  # 3 feature rows -> B = 4

    x0, col = jax.jit(f_net_forward)(x, x_feature, params)
    jax.block_until_ready((x0, col))

    x0_ref, col_ref = f_net_reference(x, x_feature, params)
    assert x0.shape == (OUT_DIM,) and col.shape == (2, OUT_DIM)
    assert jnp.allclose(x0, x0_ref, atol=1e-2, rtol=1e-2)
    assert jnp.allclose(col, col_ref, atol=1e-2, rtol=1e-2)

    print("KERNEL_OK")
</pallas_src>

<mosaic_0001>
module attributes {stable_mosaic.version = 11 : i64} {
  func.func @kernel(%arg0: i32, %arg1: i32, %arg2: memref<1x512xf32, #tpu.memory_space<vmem>>, %arg3: memref<8x512xf32, #tpu.memory_space<vmem>>, %arg4: memref<1x512x512xbf16, #tpu.memory_space<vmem>>, %arg5: memref<1x1x512xf32, #tpu.memory_space<vmem>>, %arg6: memref<512x4xbf16, #tpu.memory_space<vmem>>, %arg7: memref<1x4xf32, #tpu.memory_space<vmem>>, %arg8: memref<8x4xf32, #tpu.memory_space<vmem>>, %arg9: memref<8x512xf32, #tpu.memory_space<vmem>>) attributes {dimension_semantics = [#tpu.dimension_semantics<parallel>, #tpu.dimension_semantics<arbitrary>], iteration_bounds = array<i64: 1, 8>, scalar_prefetch = 0 : i64, scratch_operands = 1 : i64, tpu.core_type = #tpu.core_type<tc>, window_params = [{pipeline_mode = #tpu.pipeline_mode<synchronous>, transform_indices = @transform_0, window_bounds = array<i64: 1, 512>}, {transform_indices = @transform_1, window_bounds = array<i64: 8, 512>}, {transform_indices = @transform_2, window_bounds = array<i64: 1, 512, 512>}, {transform_indices = @transform_3, window_bounds = array<i64: 1, 1, 512>}, {pipeline_mode = #tpu.pipeline_mode<synchronous>, transform_indices = @transform_4, window_bounds = array<i64: 512, 4>}, {pipeline_mode = #tpu.pipeline_mode<synchronous>, transform_indices = @transform_5, window_bounds = array<i64: 1, 4>}, {transform_indices = @transform_6, window_bounds = array<i64: 8, 4>}]} {
    %c0_i32 = arith.constant 0 : i32
    %0 = arith.cmpi eq, %arg1, %c0_i32 : i32
    %1 = arith.extui %0 : i1 to i32
    %c0_i32_0 = arith.constant 0 : i32
    %2 = arith.cmpi ne, %1, %c0_i32_0 : i32
    scf.if %2 {
      %c0_13 = arith.constant 0 : index
      %c0_14 = arith.constant 0 : index
      %25 = vector.load %arg2[%c0_13, %c0_14] : memref<1x512xf32, #tpu.memory_space<vmem>>, vector<1x512xf32>
      %26 = vector.shape_cast %25 : vector<1x512xf32> to vector<1x512xf32>
      %27 = vector.broadcast %26 : vector<1x512xf32> to vector<8x512xf32>
      %c0_15 = arith.constant 0 : index
      %c0_16 = arith.constant 0 : index
      %28 = vector.load %arg9[%c0_15, %c0_16] : memref<8x512xf32, #tpu.memory_space<vmem>>, vector<8x512xf32>
      tpu.vector_store %arg9[%c0_15, %c0_16], %27 {strides = array<i32>} : memref<8x512xf32, #tpu.memory_space<vmem>>, vector<8x512xf32>,
    } else {
    }
    %c4_i32 = arith.constant 4 : i32
    %3 = arith.cmpi eq, %arg1, %c4_i32 : i32
    %4 = arith.extui %3 : i1 to i32
    %c0_i32_1 = arith.constant 0 : i32
    %5 = arith.cmpi ne, %4, %c0_i32_1 : i32
    scf.if %5 {
      %c0_13 = arith.constant 0 : index
      %c0_14 = arith.constant 0 : index
      %25 = vector.load %arg9[%c0_13, %c0_14] : memref<8x512xf32, #tpu.memory_space<vmem>>, vector<8x512xf32>
      %c0_15 = arith.constant 0 : index
      %c0_16 = arith.constant 0 : index
      %26 = vector.load %arg3[%c0_15, %c0_16] : memref<8x512xf32, #tpu.memory_space<vmem>>, vector<8x512xf32>
      %27 = arith.addf %25, %26 : vector<8x512xf32>
      %c0_17 = arith.constant 0 : index
      %c0_18 = arith.constant 0 : index
      %28 = vector.load %arg9[%c0_17, %c0_18] : memref<8x512xf32, #tpu.memory_space<vmem>>, vector<8x512xf32>
      tpu.vector_store %arg9[%c0_17, %c0_18], %27 {strides = array<i32>} : memref<8x512xf32, #tpu.memory_space<vmem>>, vector<8x512xf32>,
    } else {
    }
    %c0 = arith.constant 0 : index
    %c0_2 = arith.constant 0 : index
    %6 = vector.load %arg9[%c0, %c0_2] : memref<8x512xf32, #tpu.memory_space<vmem>>, vector<8x512xf32>
    %7 = arith.truncf %6 : vector<8x512xf32> to vector<8x512xbf16>
    %c0_3 = arith.constant 0 : index
    %c0_4 = arith.constant 0 : index
    %c0_5 = arith.constant 0 : index
    %8 = vector.load %arg4[%c0_3, %c0_4, %c0_5] : memref<1x512x512xbf16, #tpu.memory_space<vmem>>, vector<1x512x512xbf16>
    %9 = vector.shape_cast %8 : vector<1x512x512xbf16> to vector<512x512xbf16>
    %cst = arith.constant dense<0.000000e+00> : vector<8x512xf32>
    %10 = tpu.matmul %7, %9, %cst {dimension_numbers = #tpu.dot_dimension_numbers<[1], [0], [0], [1], [0, 0, 1, 1], [], []>} : vector<8x512xbf16>, vector<512x512xbf16>, vector<8x512xf32> -> vector<8x512xf32>
    %c0_6 = arith.constant 0 : index
    %c0_7 = arith.constant 0 : index
    %c0_8 = arith.constant 0 : index
    %11 = vector.load %arg5[%c0_6, %c0_7, %c0_8] : memref<1x1x512xf32, #tpu.memory_space<vmem>>, vector<1x1x512xf32>
    %12 = vector.shape_cast %11 : vector<1x1x512xf32> to vector<1x512xf32>
    %13 = vector.broadcast %12 : vector<1x512xf32> to vector<8x512xf32>
    %14 = arith.addf %10, %13 : vector<8x512xf32>
    %15 = arith.negf %14 : vector<8x512xf32>
    %16 = math.exp %15 : vector<8x512xf32>
    %cst_9 = arith.constant 1.000000e+00 : f32
    %17 = vector.broadcast %cst_9 : f32 to vector<8x512xf32>
    %18 = arith.addf %17, %16 : vector<8x512xf32>
    %19 = arith.divf %17, %18 : vector<8x512xf32>
    %20 = arith.mulf %14, %19 : vector<8x512xf32>
    %c0_10 = arith.constant 0 : index
    %c0_11 = arith.constant 0 : index
    %21 = vector.load %arg9[%c0_10, %c0_11] : memref<8x512xf32, #tpu.memory_space<vmem>>, vector<8x512xf32>
    tpu.vector_store %arg9[%c0_10, %c0_11], %20 {strides = array<i32>} : memref<8x512xf32, #tpu.memory_space<vmem>>, vector<8x512xf32>,
    %c7_i32 = arith.constant 7 : i32
    %22 = arith.cmpi eq, %arg1, %c7_i32 : i32
    %23 = arith.extui %22 : i1 to i32
    %c0_i32_12 = arith.constant 0 : i32
    %24 = arith.cmpi ne, %23, %c0_i32_12 : i32
    scf.if %24 {
      %c0_13 = arith.constant 0 : index
      %c0_14 = arith.constant 0 : index
      %25 = vector.load %arg9[%c0_13, %c0_14] : memref<8x512xf32, #tpu.memory_space<vmem>>, vector<8x512xf32>
      %26 = arith.truncf %25 : vector<8x512xf32> to vector<8x512xbf16>
      %c0_15 = arith.constant 0 : index
      %c0_16 = arith.constant 0 : index
      %27 = vector.load %arg6[%c0_15, %c0_16] : memref<512x4xbf16, #tpu.memory_space<vmem>>, vector<512x4xbf16>
      %cst_17 = arith.constant dense<0.000000e+00> : vector<8x4xf32>
      %28 = tpu.matmul %26, %27, %cst_17 {dimension_numbers = #tpu.dot_dimension_numbers<[1], [0], [0], [1], [0, 0, 1, 1], [], []>} : vector<8x512xbf16>, vector<512x4xbf16>, vector<8x4xf32> -> vector<8x4xf32>
      %c0_18 = arith.constant 0 : index
      %c0_19 = arith.constant 0 : index
      %29 = vector.load %arg7[%c0_18, %c0_19] : memref<1x4xf32, #tpu.memory_space<vmem>>, vector<1x4xf32>
      %30 = vector.broadcast %29 : vector<1x4xf32> to vector<8x4xf32>
      %31 = arith.addf %28, %30 : vector<8x4xf32>
      %c0_20 = arith.constant 0 : index
      %c0_21 = arith.constant 0 : index
      %32 = vector.load %arg8[%c0_20, %c0_21] : memref<8x4xf32, #tpu.memory_space<vmem>>, vector<8x4xf32>
      tpu.vector_store %arg8[%c0_20, %c0_21], %31 {strides = array<i32>} : memref<8x4xf32, #tpu.memory_space<vmem>>, vector<8x4xf32>,
    } else {
    }
    return
  }
  func.func @transform_0(%arg0: i32, %arg1: i32) -> (i32, i32) {
    %c0_i32 = arith.constant 0 : i32
    %c0_i32_0 = arith.constant 0 : i32
    %c0_i32_1 = arith.constant 0 : i32
    return %c0_i32, %c0_i32_0 : i32, i32
  }
  func.func @transform_1(%arg0: i32, %arg1: i32) -> (i32, i32) {
    %c0_i32 = arith.constant 0 : i32
    %c0_i32_0 = arith.constant 0 : i32
    return %arg0, %c0_i32 : i32, i32
  }
  func.func @transform_2(%arg0: i32, %arg1: i32) -> (i32, i32, i32) {
    %c0_i32 = arith.constant 0 : i32
    %c0_i32_0 = arith.constant 0 : i32
    %c0_i32_1 = arith.constant 0 : i32
    return %arg1, %c0_i32, %c0_i32_0 : i32, i32, i32
  }
  func.func @transform_3(%arg0: i32, %arg1: i32) -> (i32, i32, i32) {
    %c0_i32 = arith.constant 0 : i32
    %c0_i32_0 = arith.constant 0 : i32
    %c0_i32_1 = arith.constant 0 : i32
    return %arg1, %c0_i32, %c0_i32_0 : i32, i32, i32
  }
  func.func @transform_4(%arg0: i32, %arg1: i32) -> (i32, i32) {
    %c0_i32 = arith.constant 0 : i32
    %c0_i32_0 = arith.constant 0 : i32
    %c0_i32_1 = arith.constant 0 : i32
    return %c0_i32, %c0_i32_0 : i32, i32
  }
  func.func @transform_5(%arg0: i32, %arg1: i32) -> (i32, i32) {
    %c0_i32 = arith.constant 0 : i32
    %c0_i32_0 = arith.constant 0 : i32
    %c0_i32_1 = arith.constant 0 : i32
    return %c0_i32, %c0_i32_0 : i32, i32
  }
  func.func @transform_6(%arg0: i32, %arg1: i32) -> (i32, i32) {
    %c0_i32 = arith.constant 0 : i32
    %c0_i32_0 = arith.constant 0 : i32
    return %arg0, %c0_i32 : i32, i32
  }
}

</mosaic_0001>

<bundles_post_ra>
// kernel: f_net_forward.1
= control target key start
LH: loop header
LB: loop body
LE: loop exit
PB: predicated region body
PF: predicated region fallthrough
CT: control target
= control target key end

     0   :  { %s3159_s0 = inlined_call_operand.hbm [shape: f32[1,512], index: 0, kind: input, shape index: {}]   ;;  %s3160_s1 = inlined_call_operand.vmem [shape: f32[8,512], index: 1, kind: input, shape index: {}]   ;;  %s3161_s2 = inlined_call_operand.hbm [shape: bf16[8,512,512], index: 2, kind: input, shape index: {}]   ;;  %s3162_s3 = inlined_call_operand.hbm [shape: f32[8,1,512], index: 3, kind: input, shape index: {}]   ;;  %s3163_s4 = inlined_call_operand.vmem [shape: bf16[512,4], index: 4, kind: input, shape index: {}]   ;;  %s3164_s5 = inlined_call_operand.hbm [shape: f32[1,4], index: 5, kind: input, shape index: {}]   ;;  %s3165_s6 = inlined_call_operand.vmem [shape: f32[8,4], index: 6, kind: output, shape index: {}]  }
   0x1   :  { %3176 = sst [smem:[#allocation15_spill]] %s3161_s2 }
   0x2   :  { %11 = vsyncpa [#allocation4], 0 }
   0x3   :  { %12 = vsyncpa [#allocation6], 0 }
   0x4   :  { %14 = vsyncpa [#allocation6 + $0x1], 0 }
   0x5   :  { %15 = vsyncpa [#allocation9], 0  ;;  %s2678_s21 = smov 0   ;;  %s2680_s22 = smov 0  }
   0x6   :  { %s2682_s23 = smov 0   ;;  %s2684_s24 = smov 0  }
   0x7   :  { %s2686_s25 = smov 0   ;;  %s2688_s26 = smov 0  }
   0x8 LB: > { %3177 = sst [smem:[#allocation13_spill]] %s2631_s25  ;;  %s30_s27 = sadd.s32 1, %s2631_s25  ;;  %s2635_s26 = sphi %s2688_s26, %s21_s26   ;;  %s2631_s25 = sphi %s2686_s25, %s3193_s25   ;;  %s2627_s24 = sphi %s2684_s24, %s3192_s24   ;;  %s2623_s23 = sphi %s2682_s23, %s3196_s23   ;;  %s2619_s22 = sphi %s2680_s22, %s3195_s22   ;;  %s2615_s21 = sphi %s2678_s21, %s3194_s21  }
   0x9   : > { %s87_s28 = sadd.s32 1, %s2623_s23  ;;  %p31_p0 = scmp.ge.s32.totalorder %s30_s27, 8 }
   0xa   : > { %p94_p1 = scmp.ne.s32.totalorder %s2623_s23, %s2619_s22  ;;  %p95_p2 = scmp.eq.s32.totalorder %s2635_s26, 0 }
   0xb   : > { %s3198_s27 = smov (%p31_p0, %s30_s27), 0  ;;  %p2166_p4 = scmp.lt.s32.totalorder %s2635_s26, 8 }
   0xc   : > { %3178 = sst [smem:[#allocation14_spill]] %s3198_s27  ;;  %p96_p3 = por %p95_p2, %p94_p1 }
   0xd   : > { %s84_s29 = ssub.s32 %s2631_s25, %s3198_s27  ;;  %s251_s30 = sand.u32 1, %s2635_s26  }
   0xe   : > { %p85_p5 = scmp.eq.s32.totalorder %s84_s29, 0  ;;  %s253_s7 = sand.u32 1, %s2623_s23  }
   0xf   : > { %s2080_s8 = sshll.u32 %s2631_s25, 14  ;;  %s1898_s10 = sshll.u32 %s253_s7, 10 }
  0x10   : > { %s2722_s9 = scalar_select %p85_p5, %s2623_s23, %s87_s28  }
  0x11   : > { %s3179_s2 = sld [smem:[#allocation15_spill]]  ;;  %p2731_p6 = pnand %p2166_p4, %p96_p3 }
  0x12   : > { %s255_s15 = scalar_lea.vmem [#allocation5], %s1898_s10  ;;  %s2737_s17 = scalar_lea.sflag [#allocation6], %s251_s30 }
  0x13   : > { %s3180_s14 = scalar_select %p2731_p6, 1, 0 }
  0x14   : > { %s262_s16 = sshll.u32 %s255_s15, 4  ;;  %p3169_p8 = pneg %p2731_p6  ;;  %s2735_s16 = int_to_ptr.vmem [resolvable:$true] %s262_s16 }
  0x17   : > { %s2729_s13 = scalar_lea.hbm %s3179_s2, %s2080_s8  ;;  %s2466_s28 = scalar_lea.hbm %s3179_s2, 131072 }
  0x18   : > { %s2461_s18 = scalar_lea.hbm %s2729_s13, 16384  ;;  %p2467_p11 = scmp.lt.u32.totalorder %s2729_s13, %s3179_s2 }
  0x19   : > { %p2462_p7 = scmp.ne.s32.totalorder %s2729_s13, %s2461_s18  ;;  %p2468_p12 = scmp.lt.u32.totalorder %s2466_s28, %s2461_s18 }
  0x1a   : > { %p2470_p0 = scmp.lt.u32.totalorder %s2461_s18, %s2729_s13 }
  0x1b   : > { %p2464_p9 = pnand %p3169_p8, %p2462_p7  ;;  %p2469_p13 = por %p2468_p12, %p2467_p11 }
  0x1d   : > { %p2465_p10 = pneg %p2464_p9  ;;  %p2471_p1 = por %p2470_p0, %p2469_p13 }
  0x1f   : > { %p2472_p2 = pnand %p2471_p1, %p2465_p10 }
  0x21   : > { %2475 = shalt.err (!%p2472_p2)
}
  0x22   : > { %s2476_s30 = scalar_lea.vmem %s2735_s16, 16384  ;;  %s2637_s10 = smov [#allocation5]  }
  0x23   : > { %p2477_p3 = scmp.ne.s32.totalorder %s2735_s16, %s2476_s30  ;;  %s2481_s11 = sshll.u32 %s2637_s10, 4  ;;  %s2482_s11 = int_to_ptr.vmem [resolvable:$false] %s2481_s11 }
  0x24   : > { %s2483_s12 = scalar_lea.vmem %s2482_s11, 32768  ;;  %p2484_p7 = scmp.lt.s32.totalorder %s2735_s16, %s2482_s11 }
  0x25   : > { %p2479_p4 = pnand %p2477_p3, %p3169_p8  ;;  %p2485_p9 = scmp.lt.s32.totalorder %s2483_s12, %s2476_s30 }
  0x27   : > { %p2480_p5 = pneg %p2479_p4  ;;  %p2486_p11 = por %p2485_p9, %p2484_p7 }
  0x29   : > { %p2487_p12 = pnand %p2486_p11, %p2480_p5 }
  0x2b   : > { %2490 = shalt.err (!%p2487_p12)
}
  0x2c   : > { %s2638_s15 = smov 256   ;;  %s2639_s18 = smov 16  }
  0x2d   : > { %2160 = dma.hbm_to_vmem [thread:$0]  (!%p2731_p6), %s2729_s13, 16384, %s2735_s16, %s2737_s17, %s2638_s15, %s2638_s15, %s2639_s18  }
  0x2e   : > { %s3166_s19 = sadd.s32 4294967295, %s2635_s26   ;;  %p100_p10 = scmp.ne.s32.totalorder %s2619_s22, %s2615_s21 }
  0x2f   : > { %p2770_p13 = scmp.eq.s32.totalorder %s3166_s19, 0  ;;  %p1893_p0 = scmp.ge.s32.totalorder %s2635_s26, 1 }
  0x30   : > { %p205_p1 = scmp.lt.s32.totalorder %s2635_s26, 9  ;;  %s2640_s21 = smov [#allocation3]  }
  0x31   : > { %s3181_s20 = scalar_select %p2770_p13, 1, 0 }
  0x32   : > { %p2778_p2 = por %p2770_p13, %p100_p10  ;;  %p2782_p3 = pnand %p1893_p0, %p205_p1 }
  0x33   : > { %s218_s13 = sshll.u32 %s2640_s21, 4  ;;  %s2641_s16 = smov [#allocation8]   ;;  %s219_s13 = int_to_ptr.vmem [resolvable:$true] %s218_s13 }
  0x34   : > { %s3182_s28 = scalar_select %p2778_p2, 1, 0 }
  0x35   : > { %s3183_s29 = scalar_select %p2782_p3, 1, 0 }
  0x36   : > { %p2150_p4 = pneg %p2782_p3  ;;  %s240_s8 = sshll.u32 %s2641_s16, 4  ;;  %s2798_s8 = int_to_ptr.vmem [resolvable:$true] %s240_s8 }
  0x37   : > { %s2790_s30 = sshll.u32 %s253_s7, 2  ;;  %s2081_s11 = sshll.u32 %s2631_s25, 6 }
  0x38   : > { %p2794_p5 = pnand %p2150_p4, %p2770_p13  ;;  %s2804_s18 = scalar_lea.hbm %s3162_s3, %s2081_s11 }
  0x39   : > { %s2491_s7 = scalar_lea.hbm %s3159_s0, 64 }
  0x3a   : > { %p2492_p7 = scmp.ne.s32.totalorder %s3159_s0, %s2491_s7  ;;  %p2493_p9 = pneg %p2794_p5 }
  0x3b   : > { %p2498_p10 = scmp.lt.u32.totalorder %s2491_s7, %s3159_s0 }
  0x3c   : > { %p2494_p11 = pnand %p2493_p9, %p2492_p7 }
  0x3e   : > { %p2495_p12 = pneg %p2494_p11 }
  0x40   : > { %p2500_p0 = pnand %p2498_p10, %p2495_p12 }
  0x42   : > { %2503 = shalt.err (!%p2500_p0)
}
  0x43   : > { %s2504_s11 = scalar_lea.vmem %s219_s13, 64  ;;  %p2512_p2 = scmp.lt.s32.totalorder %s219_s13, %s219_s13 }
  0x44   : > { %p2505_p1 = scmp.ne.s32.totalorder %s219_s13, %s2504_s11  ;;  %p2513_p13 = scmp.lt.s32.totalorder %s2504_s11, %s2504_s11 }
  0x46   : > { %p2507_p4 = pnand %p2505_p1, %p2493_p9  ;;  %p2514_p3 = por %p2513_p13, %p2512_p2 }
  0x48   : > { %p2508_p8 = pneg %p2507_p4 }
  0x4a   : > { %p2515_p6 = pnand %p2514_p3, %p2508_p8 }
  0x4c   : > { %2518 = shalt.err (!%p2515_p6)
}
  0x4d   : > { %2153 = dma.hbm_to_vmem [thread:$0]  (!%p2794_p5), %s3159_s0, 64, %s219_s13, [#allocation4]  }
  0x4e   : > { %s2519_s12 = scalar_lea.hbm %s3164_s5, 16 }
  0x4f   : > { %p2520_p7 = scmp.ne.s32.totalorder %s3164_s5, %s2519_s12  ;;  %p2526_p6 = scmp.lt.u32.totalorder %s2519_s12, %s3164_s5 }
  0x51   : > { %p2522_p13 = pnand %p2520_p7, %p2493_p9 }
  0x53   : > { %p2523_p8 = pneg %p2522_p13 }
  0x55   : > { %p2528_p2 = pnand %p2526_p6, %p2523_p8 }
  0x57   : > { %2531 = shalt.err (!%p2528_p2)
}
  0x58   : > { %s2532_s13 = scalar_lea.vmem %s2798_s8, 16  ;;  %s2539_s11 = scalar_lea.vmem %s2798_s8, 32 }
  0x59   : > { %p2533_p3 = scmp.ne.s32.totalorder %s2798_s8, %s2532_s13  ;;  %p2540_p10 = scmp.lt.s32.totalorder %s2798_s8, %s2798_s8 }
  0x5a   : > { %p2541_p0 = scmp.lt.s32.totalorder %s2539_s11, %s2532_s13 }
  0x5b   : > { %p2535_p11 = pnand %p2533_p3, %p2493_p9 }
  0x5c   : > { %p2542_p1 = por %p2541_p0, %p2540_p10 }
  0x5d   : > { %p2536_p12 = pneg %p2535_p11 }
  0x5f   : > { %p2543_p4 = pnand %p2542_p1, %p2536_p12 }
  0x61   : > { %2546 = shalt.err (!%p2543_p4)
}
  0x62   : > { %2156 = dma.hbm_to_vmem [thread:$0]  (!%p2794_p5), %s3164_s5, 16, %s2798_s8, [#allocation9]  }
  0x63   : > { %s276_s25 = scalar_lea.vmem [#allocation7], %s2790_s30  ;;  %s2547_s12 = scalar_lea.hbm %s2804_s18, 64 }
  0x64   : > { %s284_s27 = sshll.u32 %s276_s25, 4  ;;  %p2548_p9 = scmp.ne.s32.totalorder %s2804_s18, %s2547_s12  ;;  %s285_s27 = int_to_ptr.vmem [resolvable:$true] %s284_s27 }
  0x65   : > { %p3185_p7 = scmp.ne.s32.totalorder %s3180_s14, 0  ;;  %s2552_s21 = scalar_lea.hbm %s3162_s3, 512 }
  0x66   : > { %p2553_p2 = scmp.lt.u32.totalorder %s2804_s18, %s3162_s3  ;;  %p2554_p3 = scmp.lt.u32.totalorder %s2552_s21, %s2547_s12 }
  0x67   : > { %p3186_p13 = pneg %p3185_p7  ;;  %p2556_p5 = scmp.lt.u32.totalorder %s2547_s12, %s2804_s18 }
  0x68   : > { %p2555_p11 = por %p2554_p3, %p2553_p2 }
  0x69   : > { %p2550_p8 = pnand %p2548_p9, %p3186_p13 }
  0x6a   : > { %p2557_p12 = por %p2556_p5, %p2555_p11 }
  0x6b   : > { %p2551_p6 = pneg %p2550_p8 }
  0x6d   : > { %p2558_p10 = pnand %p2557_p12, %p2551_p6 }
  0x6f   : > { %2561 = shalt.err (!%p2558_p10)
}
  0x70   : > { %s2562_s8 = scalar_lea.vmem %s285_s27, 64  ;;  %p3187_p1 = pmov %p3186_p13 }
  0x71   : > { %p2563_p0 = scmp.ne.s32.totalorder %s285_s27, %s2562_s8  ;;  %s2642_s30 = smov [#allocation7]  }
  0x72   : > { %s2567_s13 = sshll.u32 %s2642_s30, 4  ;;  %s2568_s13 = int_to_ptr.vmem [resolvable:$false] %s2567_s13 }
  0x73   : > { %p2565_p4 = pnand %p2563_p0, %p3187_p1  ;;  %s2569_s11 = scalar_lea.vmem %s2568_s13, 128 }
  0x74   : > { %p2570_p13 = scmp.lt.s32.totalorder %s285_s27, %s2568_s13  ;;  %p2571_p8 = scmp.lt.s32.totalorder %s2569_s11, %s2562_s8 }
  0x75   : > { %p2566_p9 = pneg %p2565_p4 }
  0x76   : > { %p2572_p2 = por %p2571_p8, %p2570_p13 }
  0x78   : > { %p2573_p3 = pnand %p2572_p2, %p2566_p9 }
  0x7a   : > { %2576 = shalt.err (!%p2573_p3)
}
  0x7b   : > { %2163 = dma.hbm_to_vmem [thread:$0]  (!%p3185_p7), %s2804_s18, 64, %s285_s27, %s2737_s17  }
  0x7c   : > { %p3188_p6 = scmp.ne.s32.totalorder %s3183_s29, 0 }
  0x7d   : > { %p3189_p11 = scmp.ne.s32.totalorder (!%p3188_p6), %s3181_s20, 0 }
  0x7e   : > { %293 = sbr.rel (%p3188_p6) target bundleno = 769 (0x301), region = 44 }
  0x85   : > { %2602 = dma.done.wait (%p3189_p11), [#allocation4], 64  }
  0x86   : > { %2604 = vsyncadd (%p3189_p11), [#allocation4], 4294967232  ;;  %s3190_s2 = sadd.s32 4294967295, %s2635_s26   ;;  %s301_s25 = sand.u32 1, %s2619_s22  }
  0x87   : > { %s299_s19 = sand.u32 1, %s3190_s2   ;;  %s1906_s12 = sshll.u32 %s301_s25, 10 }
  0x88   : > { %s300_s14 = scalar_lea.sflag [#allocation6], %s299_s19  ;;  %s2884_s10 = scalar_lea.vmem [#allocation5], %s1906_s12 }
  0x89   : > { %p3191_p7 = scmp.ne.s32.totalorder %s3182_s28, 0 }
  0x8b   : > { %2606 = dma.done.wait (%p3191_p7), %s300_s14, 16448  }
  0x8c   : > { %2608 = vsyncadd (%p3191_p7), %s300_s14, 4294950848  ;;  %s2890_s17 = sshll.u32 %s301_s25, 2 }
  0x8d   : > { %s312_s29 = scalar_lea.vmem [#allocation7], %s2890_s17 }
  0x8e   : > { %2610 = dma.done.wait (%p3189_p11), [#allocation9], 16  }
  0x8f   : > { %2612 = vsyncadd (%p3189_p11), [#allocation9], 4294967280  ;;  %p1909_p5 = scmp.ne.s32.totalorder %s2627_s24, 0 }
  0x90   : > { %v370_v0 = vlaneseq (!%p1909_p5)  ;;  %v368_v2 = vld [vmem:[#allocation3] sm:$0xf] (!%p1909_p5) }
  0x91   : > { %367 = sbr.rel (%p1909_p5) target bundleno = 154 (0x9a), region = 64 }
  0x92   : > { %v371_v1 = vshrl.u32 (!%p1909_p5), %v370_v0, 7 }
  0x94   : > { %v372_v3 = vsub.s32 (!%p1909_p5), 0, %v371_v1  ;;  %v376_v4 = vsub.s32 (!%p1909_p5), 1, %v371_v1  ;;  %v380_v5 = vsub.s32 (!%p1909_p5), 2, %v371_v1  ;;  %v384_v6 = vsub.s32 (!%p1909_p5), 3, %v371_v1 }
  0x96   : > { %v373_v7 = vrot.slane (!%p1909_p5), %v368_v2, %v372_v3  ;;  %v377_v8 = vrot.slane (!%p1909_p5), %v368_v2, %v376_v4  ;;  %v381_v9 = vrot.slane (!%p1909_p5), %v368_v2, %v380_v5  ;;  %v385_v10 = vrot.slane (!%p1909_p5), %v368_v2, %v384_v6 }
  0x98   : > { %390 = vst [vmem:[#allocation2] sm:$0xff] %v373_v7  ;;  %391 = vst [vmem:[#allocation2 + $0x8] sm:$0xff] %v377_v8 }
  0x99   : > { %392 = vst [vmem:[#allocation2 + $0x10] sm:$0xff] %v381_v9  ;;  %393 = vst [vmem:[#allocation2 + $0x18] sm:$0xff] %v385_v10 }
  0x9a PF: > { %p1910_p12 = scmp.ne.s32.totalorder %s2627_s24, 4 }
  0x9b   : > { %v402_v12 = vld [vmem:[%s3160_s1] sm:$0xff] (!%p1910_p12)  ;;  %v403_v15 = vld [vmem:[%s3160_s1 + $0x8] sm:$0xff] (!%p1910_p12)  ;;  %v404_v17 = vld [vmem:[%s3160_s1 + $0x10] sm:$0xff] (!%p1910_p12) }
  0x9c   : > { %397 = sbr.rel (%p1910_p12) target bundleno = 165 (0xa5), region = 68  ;;  %v405_v21 = vld [vmem:[%s3160_s1 + $0x18] sm:$0xff] (!%p1910_p12) }
  0xa0   : > { %v400_v16 = vld [vmem:[#allocation2 + $0x10] sm:$0xff] (!%p1910_p12)  ;;  %v401_v20 = vld [vmem:[#allocation2 + $0x18] sm:$0xff] (!%p1910_p12) }
  0xa1   : > { %v398_v11 = vld [vmem:[#allocation2] sm:$0xff] (!%p1910_p12)  ;;  %v399_v13 = vld [vmem:[#allocation2 + $0x8] sm:$0xff] (!%p1910_p12)  ;;  %v408_v19 = vadd.f32 (!%p1910_p12), %v404_v17, %v400_v16  ;;  %v409_v22 = vadd.f32 (!%p1910_p12), %v405_v21, %v401_v20 }
  0xa2   : > { %v406_v14 = vadd.f32 (!%p1910_p12), %v402_v12, %v398_v11  ;;  %v407_v18 = vadd.f32 (!%p1910_p12), %v403_v15, %v399_v13 }
  0xa3   : > { %412 = vst [vmem:[#allocation2 + $0x10] sm:$0xff] %v408_v19  ;;  %413 = vst [vmem:[#allocation2 + $0x18] sm:$0xff] %v409_v22 }
  0xa4   : > { %410 = vst [vmem:[#allocation2] sm:$0xff] %v406_v14  ;;  %411 = vst [vmem:[#allocation2 + $0x8] sm:$0xff] %v407_v18 }
  0xa5 PF: > { %v2221_v23 = vld [vmem:[%s2884_s10 + $0x4] ss:$16 sps:$4 sm:$0xff]   ;;  %v2223_v24 = vld [vmem:[%s2884_s10 + $0xc] ss:$16 sps:$4 sm:$0xff]   ;;  %v2225_v25 = vld [vmem:[%s2884_s10] ss:$16 sps:$4 sm:$0xff]  }
  0xa6   : > { %1212 = vmatprep.subr.bf16.mxu0 %v2221_v23  ;;  %v2226_v26 = vld [vmem:[%s2884_s10 + $0x8] ss:$16 sps:$4 sm:$0xff]   ;;  %1294 = vmatprep.subr.bf16.mxu1 %v2223_v24  ;;  %v2227_v27 = vld [vmem:[%s2884_s10 + $0x24] ss:$16 sps:$4 sm:$0xff]   ;;  %v2229_v28 = vld [vmem:[%s2884_s10 + $0x2c] ss:$16 sps:$4 sm:$0xff]  }
  0xa7   : > { %1213 = vmatpush1.bf16.msra.mxu0 %v2225_v25  ;;  %1295 = vmatpush1.bf16.msra.mxu1 %v2226_v26  ;;  %v2231_v29 = vld [vmem:[%s2884_s10 + $0x20] ss:$16 sps:$4 sm:$0xff]   ;;  %v2232_v30 = vld [vmem:[%s2884_s10 + $0x28] ss:$16 sps:$4 sm:$0xff]   ;;  %v2233_v31 = vld [vmem:[%s2884_s10 + $0x44] ss:$16 sps:$4 sm:$0xff]  }
  0xa8   : > { %1214 = vmatprep.subr.bf16.mxu0 %v2227_v27  ;;  %1296 = vmatprep.subr.bf16.mxu1 %v2229_v28  ;;  %v2235_v32 = vld [vmem:[%s2884_s10 + $0x4c] ss:$16 sps:$4 sm:$0xff]   ;;  %v2237_v33 = vld [vmem:[%s2884_s10 + $0x40] ss:$16 sps:$4 sm:$0xff]   ;;  %v2238_v34 = vld [vmem:[%s2884_s10 + $0x48] ss:$16 sps:$4 sm:$0xff]  }
  0xa9   : > { %v2239_v35 = vld [vmem:[%s2884_s10 + $0x64] ss:$16 sps:$4 sm:$0xff]   ;;  %v2241_v36 = vld [vmem:[%s2884_s10 + $0x6c] ss:$16 sps:$4 sm:$0xff]   ;;  %v2243_v37 = vld [vmem:[%s2884_s10 + $0x60] ss:$16 sps:$4 sm:$0xff]  }
  0xaa   : > { %v2244_v38 = vld [vmem:[%s2884_s10 + $0x68] ss:$16 sps:$4 sm:$0xff]   ;;  %v2245_v39 = vld [vmem:[%s2884_s10 + $0x84] ss:$16 sps:$4 sm:$0xff]   ;;  %v2247_v40 = vld [vmem:[%s2884_s10 + $0x8c] ss:$16 sps:$4 sm:$0xff]  }
  0xab   : > { %1215 = vmatpush1.bf16.msra.mxu0 %v2231_v29  ;;  %1297 = vmatpush1.bf16.msra.mxu1 %v2232_v30  ;;  %v2249_v41 = vld [vmem:[%s2884_s10 + $0x80] ss:$16 sps:$4 sm:$0xff]   ;;  %v2250_v42 = vld [vmem:[%s2884_s10 + $0x88] ss:$16 sps:$4 sm:$0xff]   ;;  %v2251_v43 = vld [vmem:[%s2884_s10 + $0xa4] ss:$16 sps:$4 sm:$0xff]  }
  0xac   : > { %1216 = vmatprep.subr.bf16.mxu0 %v2233_v31  ;;  %1298 = vmatprep.subr.bf16.mxu1 %v2235_v32  ;;  %v2253_v44 = vld [vmem:[%s2884_s10 + $0xac] ss:$16 sps:$4 sm:$0xff]   ;;  %v2255_v45 = vld [vmem:[%s2884_s10 + $0xa0] ss:$16 sps:$4 sm:$0xff]   ;;  %v2256_v46 = vld [vmem:[%s2884_s10 + $0xa8] ss:$16 sps:$4 sm:$0xff]  }
  0xad   : > { %v2257_v47 = vld [vmem:[%s2884_s10 + $0xc4] ss:$16 sps:$4 sm:$0xff]   ;;  %v2259_v48 = vld [vmem:[%s2884_s10 + $0xcc] ss:$16 sps:$4 sm:$0xff]   ;;  %v2261_v49 = vld [vmem:[%s2884_s10 + $0xc0] ss:$16 sps:$4 sm:$0xff]  }
  0xae   : > { %v2262_v50 = vld [vmem:[%s2884_s10 + $0xc8] ss:$16 sps:$4 sm:$0xff]   ;;  %v2263_v51 = vld [vmem:[%s2884_s10 + $0xe4] ss:$16 sps:$4 sm:$0xff]   ;;  %v2265_v52 = vld [vmem:[%s2884_s10 + $0xec] ss:$16 sps:$4 sm:$0xff]  }
  0xaf   : > { %1217 = vmatpush1.bf16.msra.mxu0 %v2237_v33  ;;  %1299 = vmatpush1.bf16.msra.mxu1 %v2238_v34  ;;  %v2267_v53 = vld [vmem:[%s2884_s10 + $0xe0] ss:$16 sps:$4 sm:$0xff]   ;;  %v2268_v54 = vld [vmem:[%s2884_s10 + $0xe8] ss:$16 sps:$4 sm:$0xff]   ;;  %v2269_v55 = vld [vmem:[%s2884_s10 + $0x104] ss:$16 sps:$4 sm:$0xff]  }
  0xb0   : > { %1218 = vmatprep.subr.bf16.mxu0 %v2239_v35  ;;  %1300 = vmatprep.subr.bf16.mxu1 %v2241_v36  ;;  %v2271_v56 = vld [vmem:[%s2884_s10 + $0x10c] ss:$16 sps:$4 sm:$0xff]   ;;  %v2273_v57 = vld [vmem:[%s2884_s10 + $0x100] ss:$16 sps:$4 sm:$0xff]   ;;  %v2274_v58 = vld [vmem:[%s2884_s10 + $0x108] ss:$16 sps:$4 sm:$0xff]  }
  0xb1   : > { %v2275_v59 = vld [vmem:[%s2884_s10 + $0x124] ss:$16 sps:$4 sm:$0xff]   ;;  %v2277_v60 = vld [vmem:[%s2884_s10 + $0x12c] ss:$16 sps:$4 sm:$0xff]   ;;  %v2279_v61 = vld [vmem:[%s2884_s10 + $0x120] ss:$16 sps:$4 sm:$0xff]  }
  0xb2   : > { %v2280_v62 = vld [vmem:[%s2884_s10 + $0x128] ss:$16 sps:$4 sm:$0xff]   ;;  %v2281_v63 = vld [vmem:[%s2884_s10 + $0x144] ss:$16 sps:$4 sm:$0xff]   ;;  %v2283_v0 = vld [vmem:[%s2884_s10 + $0x14c] ss:$16 sps:$4 sm:$0xff]  }
  0xb3   : > { %1219 = vmatpush1.bf16.msra.mxu0 %v2243_v37  ;;  %1301 = vmatpush1.bf16.msra.mxu1 %v2244_v38  ;;  %v2285_v1 = vld [vmem:[%s2884_s10 + $0x140] ss:$16 sps:$4 sm:$0xff]   ;;  %v2286_v2 = vld [vmem:[%s2884_s10 + $0x148] ss:$16 sps:$4 sm:$0xff]   ;;  %v2287_v3 = vld [vmem:[%s2884_s10 + $0x164] ss:$16 sps:$4 sm:$0xff]  }
  0xb4   : > { %1220 = vmatprep.subr.bf16.mxu0 %v2245_v39  ;;  %1302 = vmatprep.subr.bf16.mxu1 %v2247_v40  ;;  %v2289_v4 = vld [vmem:[%s2884_s10 + $0x16c] ss:$16 sps:$4 sm:$0xff]   ;;  %v415_v5 = vld [vmem:[#allocation2 + $0x8] sm:$0xff]  ;;  %v2291_v6 = vld [vmem:[%s2884_s10 + $0x160] ss:$16 sps:$4 sm:$0xff]   ;;  %p2043_p10 = scmp.ne.s32.totalorder %s2627_s24, 7 }
  0xb5   : > { %v419_v7 = vpack.c.bf16 %v415_v5, %v415_v5  ;;  %v2292_v8 = vld [vmem:[%s2884_s10 + $0x168] ss:$16 sps:$4 sm:$0xff]   ;;  %v2293_v9 = vld [vmem:[%s2884_s10 + $0x184] ss:$16 sps:$4 sm:$0xff]   ;;  %v2295_v10 = vld [vmem:[%s2884_s10 + $0x18c] ss:$16 sps:$4 sm:$0xff]  }
  0xb6   : > { %v2297_v11 = vld [vmem:[%s2884_s10 + $0x180] ss:$16 sps:$4 sm:$0xff]   ;;  %v2298_v12 = vld [vmem:[%s2884_s10 + $0x188] ss:$16 sps:$4 sm:$0xff]   ;;  %v2299_v13 = vld [vmem:[%s2884_s10 + $0x1a4] ss:$16 sps:$4 sm:$0xff]  }
  0xb7   : > { %1221 = vmatpush1.bf16.msra.mxu0 %v2249_v41  ;;  %1303 = vmatpush1.bf16.msra.mxu1 %v2250_v42  ;;  %v2301_v14 = vld [vmem:[%s2884_s10 + $0x1ac] ss:$16 sps:$4 sm:$0xff]   ;;  %v2303_v15 = vld [vmem:[%s2884_s10 + $0x1a0] ss:$16 sps:$4 sm:$0xff]   ;;  %v2304_v16 = vld [vmem:[%s2884_s10 + $0x1a8] ss:$16 sps:$4 sm:$0xff]  }
  0xb8   : > { %1222 = vmatprep.subr.bf16.mxu0 %v2251_v43  ;;  %1304 = vmatprep.subr.bf16.mxu1 %v2253_v44  ;;  %v2305_v17 = vld [vmem:[%s2884_s10 + $0x1c4] ss:$16 sps:$4 sm:$0xff]   ;;  %v2307_v18 = vld [vmem:[%s2884_s10 + $0x1cc] ss:$16 sps:$4 sm:$0xff]   ;;  %v2309_v19 = vld [vmem:[%s2884_s10 + $0x1c0] ss:$16 sps:$4 sm:$0xff]  }
  0xb9   : > { %1244 = vmatprep.mubr.bf16.mxu0 %v419_v7  ;;  %1326 = vmatprep.mubr.bf16.mxu1 %v419_v7  ;;  %v2310_v20 = vld [vmem:[%s2884_s10 + $0x1c8] ss:$16 sps:$4 sm:$0xff]   ;;  %v2311_v21 = vld [vmem:[%s2884_s10 + $0x1e4] ss:$16 sps:$4 sm:$0xff]   ;;  %v2313_v22 = vld [vmem:[%s2884_s10 + $0x1ec] ss:$16 sps:$4 sm:$0xff]  }
  0xba   : > { %v2315_v23 = vld [vmem:[%s2884_s10 + $0x1e0] ss:$16 sps:$4 sm:$0xff]   ;;  %v2316_v24 = vld [vmem:[%s2884_s10 + $0x1e8] ss:$16 sps:$4 sm:$0xff]   ;;  %v2319_v26 = vld [vmem:[%s2884_s10 + $0x204] ss:$16 sps:$4 sm:$0xff]  }
  0xbb   : > { %1223 = vmatpush1.bf16.msra.mxu0 %v2255_v45  ;;  %1305 = vmatpush1.bf16.msra.mxu1 %v2256_v46  ;;  %v414_v25 = vld [vmem:[#allocation2] sm:$0xff]  ;;  %v2320_v30 = vld [vmem:[%s2884_s10 + $0x208] ss:$16 sps:$4 sm:$0xff]   ;;  %v2325_v31 = vld [vmem:[%s2884_s10 + $0x224] ss:$16 sps:$4 sm:$0xff]   ;;  %vm1763_vm0 = vcmask (!%p2043_p10), 31744  }
  0xbc   : > { %1224 = vmatprep.subr.bf16.mxu0 %v2257_v47  ;;  %1306 = vmatprep.subr.bf16.mxu1 %v2259_v48  ;;  %v2322_v27 = vld [vmem:[%s2884_s10 + $0x20c] ss:$16 sps:$4 sm:$0xff]   ;;  %v418_v28 = vpack.c.bf16 %v414_v25, %v414_v25  ;;  %v2317_v29 = vld [vmem:[%s2884_s10 + $0x200] ss:$16 sps:$4 sm:$0xff]   ;;  %v2326_v34 = vld [vmem:[%s2884_s10 + $0x228] ss:$16 sps:$4 sm:$0xff]  }
  0xbd   : > { %v2328_v32 = vld [vmem:[%s2884_s10 + $0x22c] ss:$16 sps:$4 sm:$0xff]   ;;  %v2323_v33 = vld [vmem:[%s2884_s10 + $0x220] ss:$16 sps:$4 sm:$0xff]   ;;  %v2331_v35 = vld [vmem:[%s2884_s10 + $0x244] ss:$16 sps:$4 sm:$0xff]  }
  0xbe   : > { %v2334_v36 = vld [vmem:[%s2884_s10 + $0x24c] ss:$16 sps:$4 sm:$0xff]   ;;  %v2329_v37 = vld [vmem:[%s2884_s10 + $0x240] ss:$16 sps:$4 sm:$0xff]   ;;  %v2332_v38 = vld [vmem:[%s2884_s10 + $0x248] ss:$16 sps:$4 sm:$0xff]  }
  0xbf   : > { %1225 = vmatpush1.bf16.msra.mxu0 %v2261_v49  ;;  %1307 = vmatpush1.bf16.msra.mxu1 %v2262_v50  ;;  %v2337_v39 = vld [vmem:[%s2884_s10 + $0x264] ss:$16 sps:$4 sm:$0xff]   ;;  %v2340_v40 = vld [vmem:[%s2884_s10 + $0x26c] ss:$16 sps:$4 sm:$0xff]   ;;  %v2335_v41 = vld [vmem:[%s2884_s10 + $0x260] ss:$16 sps:$4 sm:$0xff]  }
  0xc0   : > { %1226 = vmatprep.subr.bf16.mxu0 %v2263_v51  ;;  %1308 = vmatprep.subr.bf16.mxu1 %v2265_v52  ;;  %v2338_v42 = vld [vmem:[%s2884_s10 + $0x268] ss:$16 sps:$4 sm:$0xff]   ;;  %v2343_v43 = vld [vmem:[%s2884_s10 + $0x284] ss:$16 sps:$4 sm:$0xff]   ;;  %v2346_v44 = vld [vmem:[%s2884_s10 + $0x28c] ss:$16 sps:$4 sm:$0xff]  }
  0xc1   : > { %v2341_v45 = vld [vmem:[%s2884_s10 + $0x280] ss:$16 sps:$4 sm:$0xff]   ;;  %v2344_v46 = vld [vmem:[%s2884_s10 + $0x288] ss:$16 sps:$4 sm:$0xff]   ;;  %v2349_v47 = vld [vmem:[%s2884_s10 + $0x2a4] ss:$16 sps:$4 sm:$0xff]  }
  0xc2   : > { %v2352_v48 = vld [vmem:[%s2884_s10 + $0x2ac] ss:$16 sps:$4 sm:$0xff]   ;;  %v2347_v49 = vld [vmem:[%s2884_s10 + $0x2a0] ss:$16 sps:$4 sm:$0xff]   ;;  %v2350_v50 = vld [vmem:[%s2884_s10 + $0x2a8] ss:$16 sps:$4 sm:$0xff]  }
  0xc3   : > { %1227 = vmatpush1.bf16.msra.mxu0 %v2267_v53  ;;  %1309 = vmatpush1.bf16.msra.mxu1 %v2268_v54  ;;  %v2355_v51 = vld [vmem:[%s2884_s10 + $0x2c4] ss:$16 sps:$4 sm:$0xff]   ;;  %v2358_v52 = vld [vmem:[%s2884_s10 + $0x2cc] ss:$16 sps:$4 sm:$0xff]   ;;  %v2377_v7 = vld [vmem:[%s2884_s10 + $0x340] ss:$16 sps:$4 sm:$0xff]  }
  0xc4   : > { %1228 = vmatprep.subr.bf16.mxu0 %v2269_v55  ;;  %1310 = vmatprep.subr.bf16.mxu1 %v2271_v56  ;;  %v417_v53 = vld [vmem:[#allocation2 + $0x18] sm:$0xff]  ;;  %v2353_v55 = vld [vmem:[%s2884_s10 + $0x2c0] ss:$16 sps:$4 sm:$0xff]  }
  0xc5   : > { %v421_v54 = vpack.c.bf16 %v417_v53, %v417_v53  ;;  %v2356_v56 = vld [vmem:[%s2884_s10 + $0x2c8] ss:$16 sps:$4 sm:$0xff]   ;;  %v2379_v5 = vld [vmem:[%s2884_s10 + $0x344] ss:$16 sps:$4 sm:$0xff]  }
  0xc6   : > { %v2409_v25 = vld [vmem:[%s2884_s10 + $0x3e4] ss:$16 sps:$4 sm:$0xff]  }
  0xc7   : > { %1229 = vmatpush1.bf16.msra.mxu0 %v2273_v57  ;;  %1311 = vmatpush1.bf16.msra.mxu1 %v2274_v58  ;;  %v2361_v57 = vld [vmem:[%s2884_s10 + $0x2e4] ss:$16 sps:$4 sm:$0xff]   ;;  %v2364_v58 = vld [vmem:[%s2884_s10 + $0x2ec] ss:$16 sps:$4 sm:$0xff]  }
  0xc8   : > { %1230 = vmatprep.subr.bf16.mxu0 %v2275_v59  ;;  %1312 = vmatprep.subr.bf16.mxu1 %v2277_v60  ;;  %v2359_v59 = vld [vmem:[%s2884_s10 + $0x2e0] ss:$16 sps:$4 sm:$0xff]   ;;  %v2362_v60 = vld [vmem:[%s2884_s10 + $0x2e8] ss:$16 sps:$4 sm:$0xff]  }
  0xcb   : > { %1231 = vmatpush1.bf16.msra.mxu0 %v2279_v61  ;;  %1313 = vmatpush1.bf16.msra.mxu1 %v2280_v62  ;;  %v2367_v61 = vld [vmem:[%s2884_s10 + $0x304] ss:$16 sps:$4 sm:$0xff]   ;;  %v2370_v62 = vld [vmem:[%s2884_s10 + $0x30c] ss:$16 sps:$4 sm:$0xff]  }
  0xcc   : > { %1232 = vmatprep.subr.bf16.mxu0 %v2281_v63  ;;  %1314 = vmatprep.subr.bf16.mxu1 %v2283_v0  ;;  %v2365_v63 = vld [vmem:[%s2884_s10 + $0x300] ss:$16 sps:$4 sm:$0xff]   ;;  %v2368_v0 = vld [vmem:[%s2884_s10 + $0x308] ss:$16 sps:$4 sm:$0xff]  }
  0xcf   : > { %1233 = vmatpush1.bf16.msra.mxu0 %v2285_v1  ;;  %1315 = vmatpush1.bf16.msra.mxu1 %v2286_v2  ;;  %v2373_v1 = vld [vmem:[%s2884_s10 + $0x324] ss:$16 sps:$4 sm:$0xff]   ;;  %v2376_v2 = vld [vmem:[%s2884_s10 + $0x32c] ss:$16 sps:$4 sm:$0xff]  }
  0xd0   : > { %1234 = vmatprep.subr.bf16.mxu0 %v2287_v3  ;;  %1316 = vmatprep.subr.bf16.mxu1 %v2289_v4  ;;  %v2371_v3 = vld [vmem:[%s2884_s10 + $0x320] ss:$16 sps:$4 sm:$0xff]   ;;  %v2374_v4 = vld [vmem:[%s2884_s10 + $0x328] ss:$16 sps:$4 sm:$0xff]  }
  0xd3   : > { %1235 = vmatpush1.bf16.msra.mxu0 %v2291_v6  ;;  %1317 = vmatpush1.bf16.msra.mxu1 %v2292_v8  ;;  %v2382_v6 = vld [vmem:[%s2884_s10 + $0x34c] ss:$16 sps:$4 sm:$0xff]   ;;  %v2380_v8 = vld [vmem:[%s2884_s10 + $0x348] ss:$16 sps:$4 sm:$0xff]  }
  0xd4   : > { %1236 = vmatprep.subr.bf16.mxu0 %v2293_v9  ;;  %1318 = vmatprep.subr.bf16.mxu1 %v2295_v10  ;;  %v2385_v9 = vld [vmem:[%s2884_s10 + $0x364] ss:$16 sps:$4 sm:$0xff]   ;;  %v2388_v10 = vld [vmem:[%s2884_s10 + $0x36c] ss:$16 sps:$4 sm:$0xff]  }
  0xd7   : > { %1237 = vmatpush1.bf16.msra.mxu0 %v2297_v11  ;;  %1319 = vmatpush1.bf16.msra.mxu1 %v2298_v12  ;;  %v2383_v11 = vld [vmem:[%s2884_s10 + $0x360] ss:$16 sps:$4 sm:$0xff]   ;;  %v2386_v12 = vld [vmem:[%s2884_s10 + $0x368] ss:$16 sps:$4 sm:$0xff]  }
  0xd8   : > { %1238 = vmatprep.subr.bf16.mxu0 %v2299_v13  ;;  %1320 = vmatprep.subr.bf16.mxu1 %v2301_v14  ;;  %v2391_v13 = vld [vmem:[%s2884_s10 + $0x384] ss:$16 sps:$4 sm:$0xff]   ;;  %v2394_v14 = vld [vmem:[%s2884_s10 + $0x38c] ss:$16 sps:$4 sm:$0xff]  }
  0xdb   : > { %1239 = vmatpush1.bf16.msra.mxu0 %v2303_v15  ;;  %1321 = vmatpush1.bf16.msra.mxu1 %v2304_v16  ;;  %v2389_v15 = vld [vmem:[%s2884_s10 + $0x380] ss:$16 sps:$4 sm:$0xff]   ;;  %v2392_v16 = vld [vmem:[%s2884_s10 + $0x388] ss:$16 sps:$4 sm:$0xff]  }
  0xdc   : > { %1240 = vmatprep.subr.bf16.mxu0 %v2305_v17  ;;  %1322 = vmatprep.subr.bf16.mxu1 %v2307_v18  ;;  %v2397_v17 = vld [vmem:[%s2884_s10 + $0x3a4] ss:$16 sps:$4 sm:$0xff]   ;;  %v2400_v18 = vld [vmem:[%s2884_s10 + $0x3ac] ss:$16 sps:$4 sm:$0xff]  }
  0xdf   : > { %1241 = vmatpush1.bf16.msra.mxu0 %v2309_v19  ;;  %1323 = vmatpush1.bf16.msra.mxu1 %v2310_v20  ;;  %v2395_v19 = vld [vmem:[%s2884_s10 + $0x3a0] ss:$16 sps:$4 sm:$0xff]   ;;  %v2398_v20 = vld [vmem:[%s2884_s10 + $0x3a8] ss:$16 sps:$4 sm:$0xff]  }
  0xe0   : > { %1242 = vmatprep.subr.bf16.mxu0 %v2311_v21  ;;  %1324 = vmatprep.subr.bf16.mxu1 %v2313_v22  ;;  %v2403_v21 = vld [vmem:[%s2884_s10 + $0x3c4] ss:$16 sps:$4 sm:$0xff]   ;;  %v2406_v22 = vld [vmem:[%s2884_s10 + $0x3cc] ss:$16 sps:$4 sm:$0xff]  }
  0xe3   : > { %1243 = vmatpush1.bf16.msra.mxu0 %v2315_v23  ;;  %1325 = vmatpush1.bf16.msra.mxu1 %v2316_v24  ;;  %v2401_v23 = vld [vmem:[%s2884_s10 + $0x3c0] ss:$16 sps:$4 sm:$0xff]   ;;  %v2404_v24 = vld [vmem:[%s2884_s10 + $0x3c8] ss:$16 sps:$4 sm:$0xff]  }
  0xe4   : > { %1253 = vmatprep.subr.bf16.mxu0 %v2319_v26  ;;  %1335 = vmatprep.subr.bf16.mxu1 %v2322_v27  ;;  %v2412_v26 = vld [vmem:[%s2884_s10 + $0x3ec] ss:$16 sps:$4 sm:$0xff]   ;;  %v2407_v27 = vld [vmem:[%s2884_s10 + $0x3e0] ss:$16 sps:$4 sm:$0xff]  }
  0xe6   : > { %1245 = vmatmul.mubr.bf16.vlgmr.msra.gmra.mrb[0].mxu0 %v418_v28  ;;  %1327 = vmatmul.mubr.bf16.vlgmr.msra.gmra.mrb[0].mxu1 %v418_v28  ;;  %v2410_v28 = vld [vmem:[%s2884_s10 + $0x3e8] ss:$16 sps:$4 sm:$0xff]  }
  0xe7   : > { %1254 = vmatpush1.bf16.msra.mxu0 %v2317_v29  ;;  %1336 = vmatpush1.bf16.msra.mxu1 %v2320_v30  ;;  %v416_v29 = vld [vmem:[#allocation2 + $0x10] sm:$0xff] }
  0xe8   : > { %1255 = vmatprep.subr.bf16.mxu0 %v2325_v31  ;;  %1337 = vmatprep.subr.bf16.mxu1 %v2328_v32  ;;  %v420_v30 = vpack.c.bf16 %v416_v29, %v416_v29  ;;  %v552_v31 = vlaneseq  ;;  %v2448_v29 = vld [vmem:[%s3163_s4 + $0xa0] sm:$0xff] (!%p2043_p10)  }
  0xe9   : > { %1285 = vmatprep.mubr.bf16.mxu0 %v421_v54  ;;  %1367 = vmatprep.mubr.bf16.mxu1 %v421_v54 }
  0xea   : > { %v553_v32 = vshrl.u32 %v552_v31, 7  ;;  %v2450_v31 = vld [vmem:[%s3163_s4 + $0xe8] sm:$0xff] (!%p2043_p10)  }
  0xeb   : > { %1256 = vmatpush1.bf16.msra.mxu0 %v2323_v33  ;;  %1338 = vmatpush1.bf16.msra.mxu1 %v2326_v34 }
  0xec   : > { %1257 = vmatprep.subr.bf16.mxu0 %v2331_v35  ;;  %1339 = vmatprep.subr.bf16.mxu1 %v2334_v36  ;;  %v554_v33 = vsub.s32 0, %v553_v32  ;;  %v562_v34 = vsub.s32 2, %v553_v32  ;;  %v550_v35 = vld [vmem:[%s312_s29] sm:$0xf]  ;;  %v558_v36 = vsub.s32 1, %v553_v32 }
  0xef   : > { %1258 = vmatpush1.bf16.msra.mxu0 %v2329_v37  ;;  %1340 = vmatpush1.bf16.msra.mxu1 %v2332_v38  ;;  %v566_v37 = vsub.s32 3, %v553_v32  ;;  %v555_v38 = vrot.slane %v550_v35, %v554_v33  ;;  %v2451_v32 = vld [vmem:[%s3163_s4 + $0x28] sm:$0xff] (!%p2043_p10)  }
  0xf0   : > { %1259 = vmatprep.subr.bf16.mxu0 %v2337_v39  ;;  %1341 = vmatprep.subr.bf16.mxu1 %v2340_v40  ;;  %v563_v39 = vrot.slane %v550_v35, %v562_v34  ;;  %v559_v40 = vrot.slane %v550_v35, %v558_v36  ;;  %v2452_v33 = vld [vmem:[%s3163_s4 + $0xa8] sm:$0xff] (!%p2043_p10)   ;;  %v2453_v34 = vld [vmem:[%s3163_s4 + $0x70] sm:$0xff] (!%p2043_p10)  }
  0xf1   : > { %v2455_v36 = vld [vmem:[%s3163_s4 + $0x30] sm:$0xff] (!%p2043_p10)  }
  0xf3   : > { %1260 = vmatpush1.bf16.msra.mxu0 %v2335_v41  ;;  %1342 = vmatpush1.bf16.msra.mxu1 %v2338_v42  ;;  %v567_v41 = vrot.slane %v550_v35, %v566_v37  ;;  %v2454_v35 = vld [vmem:[%s3163_s4 + $0xf0] sm:$0xff] (!%p2043_p10)  }
  0xf4   : > { %1261 = vmatprep.subr.bf16.mxu0 %v2343_v43  ;;  %1343 = vmatprep.subr.bf16.mxu1 %v2346_v44  ;;  %v2456_v37 = vld [vmem:[%s3163_s4 + $0xb0] sm:$0xff] (!%p2043_p10)  }
  0xf7   : > { %1262 = vmatpush1.bf16.msra.mxu0 %v2341_v45  ;;  %1344 = vmatpush1.bf16.msra.mxu1 %v2344_v46 }
  0xf8   : > { %1263 = vmatprep.subr.bf16.mxu0 %v2349_v47  ;;  %1345 = vmatprep.subr.bf16.mxu1 %v2352_v48 }
  0xfb   : > { %1264 = vmatpush1.bf16.msra.mxu0 %v2347_v49  ;;  %1346 = vmatpush1.bf16.msra.mxu1 %v2350_v50 }
  0xfc   : > { %1265 = vmatprep.subr.bf16.mxu0 %v2355_v51  ;;  %1347 = vmatprep.subr.bf16.mxu1 %v2358_v52 }
  0xff   : > { %1266 = vmatpush1.bf16.msra.mxu0 %v2353_v55  ;;  %1348 = vmatpush1.bf16.msra.mxu1 %v2356_v56 }
 0x100   : > { %1267 = vmatprep.subr.bf16.mxu0 %v2361_v57  ;;  %1349 = vmatprep.subr.bf16.mxu1 %v2364_v58 }
 0x103   : > { %1268 = vmatpush1.bf16.msra.mxu0 %v2359_v59  ;;  %1350 = vmatpush1.bf16.msra.mxu1 %v2362_v60 }
 0x104   : > { %1269 = vmatprep.subr.bf16.mxu0 %v2367_v61  ;;  %1351 = vmatprep.subr.bf16.mxu1 %v2370_v62 }
 0x107   : > { %1270 = vmatpush1.bf16.msra.mxu0 %v2365_v63  ;;  %1352 = vmatpush1.bf16.msra.mxu1 %v2368_v0 }
 0x108   : > { %1271 = vmatprep.subr.bf16.mxu0 %v2373_v1  ;;  %1353 = vmatprep.subr.bf16.mxu1 %v2376_v2 }
 0x10b   : > { %1272 = vmatpush1.bf16.msra.mxu0 %v2371_v3  ;;  %1354 = vmatpush1.bf16.msra.mxu1 %v2374_v4 }
 0x10c   : > { %1273 = vmatprep.subr.bf16.mxu0 %v2379_v5  ;;  %1355 = vmatprep.subr.bf16.mxu1 %v2382_v6 }
 0x10f   : > { %1274 = vmatpush1.bf16.msra.mxu0 %v2377_v7  ;;  %1356 = vmatpush1.bf16.msra.mxu1 %v2380_v8 }
 0x110   : > { %1275 = vmatprep.subr.bf16.mxu0 %v2385_v9  ;;  %1357 = vmatprep.subr.bf16.mxu1 %v2388_v10  ;;  %v2429_v10 = vld [vmem:[%s3163_s4 + $0x40] sm:$0xff] (!%p2043_p10)  }
 0x113   : > { %1276 = vmatpush1.bf16.msra.mxu0 %v2383_v11  ;;  %1358 = vmatpush1.bf16.msra.mxu1 %v2386_v12  ;;  %v2430_v11 = vld [vmem:[%s3163_s4 + $0xc0] sm:$0xff] (!%p2043_p10)  }
 0x114   : > { %1277 = vmatprep.subr.bf16.mxu0 %v2391_v13  ;;  %1359 = vmatprep.subr.bf16.mxu1 %v2394_v14  ;;  %v2431_v12 = vld [vmem:[%s3163_s4] sm:$0xff] (!%p2043_p10)   ;;  %v2433_v14 = vld [vmem:[%s3163_s4 + $0x48] sm:$0xff] (!%p2043_p10)  }
 0x115   : > { %v2432_v13 = vld [vmem:[%s3163_s4 + $0x80] sm:$0xff] (!%p2043_p10)  }
 0x117   : > { %1278 = vmatpush1.bf16.msra.mxu0 %v2389_v15  ;;  %1360 = vmatpush1.bf16.msra.mxu1 %v2392_v16  ;;  %v2434_v15 = vld [vmem:[%s3163_s4 + $0xc8] sm:$0xff] (!%p2043_p10)  }
 0x118   : > { %1279 = vmatprep.subr.bf16.mxu0 %v2397_v17  ;;  %1361 = vmatprep.subr.bf16.mxu1 %v2400_v18  ;;  %v2435_v16 = vld [vmem:[%s3163_s4 + $0x8] sm:$0xff] (!%p2043_p10)   ;;  %v2437_v18 = vld [vmem:[%s3163_s4 + $0x50] sm:$0xff] (!%p2043_p10)  }
 0x119   : > { %v2436_v17 = vld [vmem:[%s3163_s4 + $0x88] sm:$0xff] (!%p2043_p10)  }
 0x11b   : > { %1280 = vmatpush1.bf16.msra.mxu0 %v2395_v19  ;;  %1362 = vmatpush1.bf16.msra.mxu1 %v2398_v20  ;;  %v2438_v19 = vld [vmem:[%s3163_s4 + $0xd0] sm:$0xff] (!%p2043_p10)  }
 0x11c   : > { %1281 = vmatprep.subr.bf16.mxu0 %v2403_v21  ;;  %1363 = vmatprep.subr.bf16.mxu1 %v2406_v22  ;;  %v2439_v20 = vld [vmem:[%s3163_s4 + $0x10] sm:$0xff] (!%p2043_p10)   ;;  %v2441_v22 = vld [vmem:[%s3163_s4 + $0x58] sm:$0xff] (!%p2043_p10)  }
 0x11d   : > { %v2440_v21 = vld [vmem:[%s3163_s4 + $0x90] sm:$0xff] (!%p2043_p10)  }
 0x11f   : > { %1282 = vmatpush1.bf16.msra.mxu0 %v2401_v23  ;;  %1364 = vmatpush1.bf16.msra.mxu1 %v2404_v24  ;;  %v2442_v23 = vld [vmem:[%s3163_s4 + $0xd8] sm:$0xff] (!%p2043_p10)  }
 0x120   : > { %1283 = vmatprep.subr.bf16.mxu0 %v2409_v25  ;;  %1365 = vmatprep.subr.bf16.mxu1 %v2412_v26  ;;  %v2443_v24 = vld [vmem:[%s3163_s4 + $0x18] sm:$0xff] (!%p2043_p10)   ;;  %v2445_v26 = vld [vmem:[%s3163_s4 + $0x60] sm:$0xff] (!%p2043_p10)  }
 0x121   : > { %v2444_v25 = vld [vmem:[%s3163_s4 + $0x98] sm:$0xff] (!%p2043_p10)  }
 0x123   : > { %1284 = vmatpush1.bf16.msra.mxu0 %v2407_v27  ;;  %1366 = vmatpush1.bf16.msra.mxu1 %v2410_v28  ;;  %v2446_v27 = vld [vmem:[%s3163_s4 + $0xe0] sm:$0xff] (!%p2043_p10)  }
 0x124   : > { %2082 = vmatprep.subr.bf16.mxu0 (!%p2043_p10), %v2429_v10  ;;  %2104 = vmatprep.subr.bf16.mxu1 (!%p2043_p10), %v2430_v11  ;;  %v2447_v28 = vld [vmem:[%s3163_s4 + $0x20] sm:$0xff] (!%p2043_p10)  }
 0x126   : > { %1286 = vmatmul.mubr.bf16.vlgmr.msra.gmra.mrb[0].mxu0 %v420_v30  ;;  %1368 = vmatmul.mubr.bf16.vlgmr.msra.gmra.mrb[0].mxu1 %v420_v30  ;;  %v2449_v30 = vld [vmem:[%s3163_s4 + $0x68] sm:$0xff] (!%p2043_p10)  }
 0x127   : > { %2083 = vmatpush3.bf16.msra.mxu0 (!%p2043_p10), %v2431_v12  ;;  %2105 = vmatpush3.bf16.msra.mxu1 (!%p2043_p10), %v2432_v13 }
 0x128   : > { %2084 = vmatprep.subr.bf16.mxu0 (!%p2043_p10), %v2433_v14  ;;  %2106 = vmatprep.subr.bf16.mxu1 (!%p2043_p10), %v2434_v15 }
 0x12b   : > { %2085 = vmatpush3.bf16.msra.mxu0 (!%p2043_p10), %v2435_v16  ;;  %2107 = vmatpush3.bf16.msra.mxu1 (!%p2043_p10), %v2436_v17 }
 0x12c   : > { %2086 = vmatprep.subr.bf16.mxu0 (!%p2043_p10), %v2437_v18  ;;  %2108 = vmatprep.subr.bf16.mxu1 (!%p2043_p10), %v2438_v19 }
 0x12f   : > { %2087 = vmatpush3.bf16.msra.mxu0 (!%p2043_p10), %v2439_v20  ;;  %2109 = vmatpush3.bf16.msra.mxu1 (!%p2043_p10), %v2440_v21 }
 0x130   : > { %2088 = vmatprep.subr.bf16.mxu0 (!%p2043_p10), %v2441_v22  ;;  %2110 = vmatprep.subr.bf16.mxu1 (!%p2043_p10), %v2442_v23 }
 0x133   : > { %2089 = vmatpush3.bf16.msra.mxu0 (!%p2043_p10), %v2443_v24  ;;  %2111 = vmatpush3.bf16.msra.mxu1 (!%p2043_p10), %v2444_v25 }
 0x134   : > { %2090 = vmatprep.subr.bf16.mxu0 (!%p2043_p10), %v2445_v26  ;;  %2112 = vmatprep.subr.bf16.mxu1 (!%p2043_p10), %v2446_v27 }
 0x137   : > { %2091 = vmatpush3.bf16.msra.mxu0 (!%p2043_p10), %v2447_v28  ;;  %2113 = vmatpush3.bf16.msra.mxu1 (!%p2043_p10), %v2448_v29 }
 0x138   : > { %2092 = vmatprep.subr.bf16.mxu0 (!%p2043_p10), %v2449_v30  ;;  %2114 = vmatprep.subr.bf16.mxu1 (!%p2043_p10), %v2450_v31 }
 0x13b   : > { %2093 = vmatpush3.bf16.msra.mxu0 (!%p2043_p10), %v2451_v32  ;;  %2115 = vmatpush3.bf16.msra.mxu1 (!%p2043_p10), %v2452_v33 }
 0x13c   : > { %2094 = vmatprep.subr.bf16.mxu0 (!%p2043_p10), %v2453_v34  ;;  %2116 = vmatprep.subr.bf16.mxu1 (!%p2043_p10), %v2454_v35 }
 0x13f   : > { %2095 = vmatpush3.bf16.msra.mxu0 (!%p2043_p10), %v2455_v36  ;;  %2117 = vmatpush3.bf16.msra.mxu1 (!%p2043_p10), %v2456_v37 }
 0x1f9   : > { %v1287_v42 = vpop.f32.mrb[0].mxu0  ;;  %v1369_v43 = vpop.f32.mrb[0].mxu1 }
 0x1fa   : > { %v2126_v44 = vadd.f32 %v1287_v42, %v555_v38  ;;  %v2128_v45 = vadd.f32 %v1369_v43, %v563_v39  ;;  %v1289_v46 = vpop.f32.mrb[1].mxu0  ;;  %v1371_v47 = vpop.f32.mrb[1].mxu1  ;;  %v2457_v38 = vld [vmem:[%s3163_s4 + $0x78] sm:$0xff] (!%p2043_p10)  }
 0x1fb   : > { %v2127_v48 = vadd.f32 %v1289_v46, %v559_v40  ;;  %v2129_v49 = vadd.f32 %v1371_v47, %v567_v41  ;;  %v1291_v50 = vpop.f32.mrb[2].mxu0  ;;  %v1373_v51 = vpop.f32.mrb[2].mxu1  ;;  %v2458_v39 = vld [vmem:[%s3163_s4 + $0xf8] sm:$0xff] (!%p2043_p10)   ;;  %2096 = vmatprep.subr.bf16.mxu0 (!%p2043_p10), %v2457_v38 }
 0x1fc   : > { %v2039_v52 = vmul.f32 -1.442695, %v2126_v44  ;;  %v2041_v53 = vmul.f32 -1.442695, %v2128_v45  ;;  %v1292_v54 = vpop.f32.mrb[3].mxu0  ;;  %v1374_v55 = vpop.f32.mrb[3].mxu1  ;;  %2118 = vmatprep.subr.bf16.mxu1 (!%p2043_p10), %v2458_v39 }
 0x1fd   : > { %v2040_v56 = vmul.f32 -1.442695, %v2127_v48  ;;  %v2042_v57 = vmul.f32 -1.442695, %v2129_v49  ;;  %v2459_v40 = vld [vmem:[%s3163_s4 + $0x38] sm:$0xff] (!%p2043_p10)  }
 0x1fe   : > { %2413 = vpow2.f32 %v2039_v52  ;;  %v2460_v41 = vld [vmem:[%s3163_s4 + $0xb8] sm:$0xff] (!%p2043_p10)   ;;  %2097 = vmatpush3.bf16.msra.mxu0 (!%p2043_p10), %v2459_v40  ;;  %v2044_v52 = vld [vmem:[#allocation8] ss:$0 sm:$0xff] (!%p2043_p10) }
 0x1ff   : > { %2415 = vpow2.f32 %v2041_v53  ;;  %2119 = vmatpush3.bf16.msra.mxu1 (!%p2043_p10), %v2460_v41 }
 0x200   : > { %2417 = vpow2.f32 %v2040_v56 }
 0x201   : > { %2419 = vpow2.f32 %v2042_v57 }
 0x208   : > { %v2414_v58 = vpop.eup %2413 }
 0x209   : > { %v2416_v59 = vpop.eup %2415  ;;  %v1388_v60 = vadd.f32 1.0, %v2414_v58 }
 0x20a   : > { %v2418_v61 = vpop.eup %2417  ;;  %v1390_v62 = vadd.f32 1.0, %v2416_v59 }
 0x20b   : > { %v2420_v63 = vpop.eup %2419  ;;  %2421 = vrcp.f32 %v1388_v60  ;;  %v1389_v0 = vadd.f32 1.0, %v2418_v61 }
 0x20c   : > { %2423 = vrcp.f32 %v1390_v62  ;;  %v1391_v1 = vadd.f32 1.0, %v2420_v63 }
 0x20d   : > { %2425 = vrcp.f32 %v1389_v0 }
 0x20e   : > { %2427 = vrcp.f32 %v1391_v1 }
 0x215   : > { %v2422_v2 = vpop.eup %2421  ;;  %1411 = sbr.rel (%p2043_p10) target bundleno = 769 (0x301), region = 72 }
 0x216   : > { %v2424_v3 = vpop.eup %2423  ;;  %v1400_v4 = vmul.f32 %v2422_v2, %v2126_v44 }
 0x217   : > { %v2426_v5 = vpop.eup %2425  ;;  %v1402_v6 = vmul.f32 %v2424_v3, %v2128_v45 }
 0x218   : > { %v2428_v7 = vpop.eup %2427  ;;  %1404 = vst [vmem:[#allocation2] sm:$0xff] %v1400_v4  ;;  %v1401_v8 = vmul.f32 %v2426_v5, %v2127_v48 }
 0x219   : > { %1406 = vst [vmem:[#allocation2 + $0x10] sm:$0xff] %v1402_v6  ;;  %v1403_v9 = vmul.f32 %v2428_v7, %v2129_v49 }
 0x21a   : > { %1405 = vst [vmem:[#allocation2 + $0x8] sm:$0xff] %v1401_v8 }
 0x21b   : > { %1407 = vst [vmem:[#allocation2 + $0x18] sm:$0xff] %v1403_v9 }
 0x21f   : > { %v1412_v44 = vld [vmem:[#allocation2] sm:$0xff] }
 0x220   : > { %v1416_v47 = vpack.c.bf16 %v1412_v44, %v1412_v44  ;;  %v1414_v48 = vld [vmem:[#allocation2 + $0x10] sm:$0xff] }
 0x221   : > { %v1413_v42 = vld [vmem:[#allocation2 + $0x8] sm:$0xff]  ;;  %v1418_v49 = vpack.c.bf16 %v1414_v48, %v1414_v48 }
 0x222   : > { %v1415_v43 = vld [vmem:[#allocation2 + $0x18] sm:$0xff]  ;;  %v1417_v45 = vpack.c.bf16 %v1413_v42, %v1413_v42 }
 0x223   : > { %v1419_v46 = vpack.c.bf16 %v1415_v43, %v1415_v43 }
 0x224   : > { %1715 = vmatprep.mubr.bf16.mxu0 %v1417_v45 }
 0x225   : > { %1755 = vmatprep.mubr.bf16.mxu1 %v1419_v46  ;;  %1716 = vmatmul.mubr.bf16.vlgmr.msra.gmra.mrb[0].mxu0 %v1416_v47 }
 0x226   : > { %1756 = vmatmul.mubr.bf16.vlgmr.msra.gmra.mrb[0].mxu1 %v1418_v49 }
 0x2f8   : > { %v2098_v50 = vpop.f32.mrb[0].mxu0 }
 0x2f9   : > { %v2120_v51 = vpop.f32.mrb[0].mxu1  ;;  %v2099_v53 = vpop.f32.mrb[1].mxu0 }
 0x2fa   : > { %v2121_v54 = vpop.f32.mrb[1].mxu1  ;;  %v2100_v55 = vadd.f32 %v2099_v53, %v2098_v50  ;;  %v2101_v57 = vpop.f32.mrb[2].mxu0 }
 0x2fb   : > { %v2122_v56 = vadd.f32 %v2121_v54, %v2120_v51  ;;  %v2123_v58 = vpop.f32.mrb[2].mxu1  ;;  %v2102_v59 = vpop.f32.mrb[3].mxu0 }
 0x2fc   : > { %v2124_v60 = vpop.f32.mrb[3].mxu1  ;;  %v1718_v61 = vadd.f32 %v2100_v55, %v2044_v52 }
 0x2fe   : > { %v1758_v62 = vadd.f32 %v2122_v56, %v1718_v61 }
 0x300   : > { %1764 = vst.msk [vmem:[%s3165_s6] sm:$0xff] %vm1763_vm0, %v1758_v62 }
 0x301 PF: > { %s21_s26 = sadd.s32 1, %s2635_s26   ;;  %s3192_s24 = sld [smem:[#allocation13_spill]] }
 0x302   : > { %p18_p0 = scmp.ge.s32.totalorder %s21_s26, 10   ;;  %s3193_s25 = sld [smem:[#allocation14_spill]] }
 0x303   : > { %s3194_s21 = smov %s2619_s22  ;;  %s3195_s22 = smov %s2623_s23 }
 0x304   : > { %s3196_s23 = smov %s2722_s9  ;;  %20 = sbr.rel (!%p18_p0) target bundleno = 8 (0x8), region = 119 }
 0x30b   :  { %1784 = vsyncpa [#allocation4], 1 }
 0x30c   :  { %1786 = vsyncpa [#allocation4 + $0x1], 1 }
 0x30d   :  { %1787 = vsyncpa [#allocation6], 1 }
 0x30e   :  { %1789 = vsyncpa [#allocation6 + $0x1], 1 }
 0x30f   :  { %1790 = vsyncpa [#allocation9], 1 }

</bundles_post_ra>
